<compile_context>
chip_gen: v6e
topology: v6e:2x2x1
jax: 0.10.0
libtpu: 0.0.40
codegen_flags: <defaults>
</compile_context>

<pallas_src>
import math

import jax
import jax.numpy as jnp
from jax.experimental import pallas as pl
from jax.experimental.pallas import tpu as pltpu


# Sublane multiple per element size (sub-32-bit dtypes pack along sublanes).
_SUBLANE_MULTIPLE = {4: 8, 2: 16, 1: 32}

# Per-block VMEM budget. BlockSpec double-buffers both input and output
# (4 live buffers), so 2 MiB blocks stay well inside every generation's
# default scoped VMEM limit.
_MAX_BLOCK_BYTES = 2 * 1024 * 1024

# Cap for the "single full-array block" path (rows not a sublane multiple).
_MAX_SINGLE_BLOCK_BYTES = 4 * 1024 * 1024

# Candidate lane widths, widest first: a wide last dim gives unmasked
# full-width stores and fewer grid steps (biggest lever for mem-bound copies).
_LANE_WIDTHS = (32768, 16384, 8192, 4096, 2048, 1024, 512, 256, 128)


def _copy_kernel(x_ref, o_ref):
    # Identity copy of the current tile; the shape change itself is pure
    # metadata handled in the wrapper (row-major view semantics).
    o_ref[...] = x_ref[...]


def _pallas_flat_copy(flat_2d, tile_rows):
    """Copy a lane-dense (rows, lanes) slab through a Pallas kernel."""
    rows, lanes = flat_2d.shape
    grid = (rows // tile_rows,)
    return pl.pallas_call(
        _copy_kernel,
        out_shape=jax.ShapeDtypeStruct((rows, lanes), flat_2d.dtype),
        grid_spec=pltpu.PrefetchScalarGridSpec(
            num_scalar_prefetch=0,
            grid=grid,
            in_specs=[pl.BlockSpec((tile_rows, lanes), lambda i: (i, 0))],
            out_specs=pl.BlockSpec((tile_rows, lanes), lambda i: (i, 0)),
        ),
        compiler_params=pltpu.CompilerParams(
            dimension_semantics=("parallel",)),
    )(flat_2d)


def _resolve_shape(shape, total):
    """Resolve a single -1 like torch .view (guarding the zero-dim case)."""
    shape = tuple(int(s) for s in shape)
    if shape.count(-1) > 1:
        raise ValueError("only one -1 dimension allowed in view shape")
    if -1 in shape:
        known = math.prod(s for s in shape if s != -1)
        if known == 0:
            raise ValueError("cannot infer -1 with a zero-sized known dimension")
        if total % known != 0:
            raise ValueError("view shape incompatible with input size")
        shape = tuple(total // known if s == -1 else s for s in shape)
    if math.prod(shape) != total:
        raise ValueError("view shape incompatible with input size")
    return shape


def _pick_slab(total, itemsize):
    """Pick (rows, lanes, tile_rows) for a pad-free lane-dense tiling.

    Returns None when the element stream cannot be tiled without padding;
    the caller then uses the metadata-only reshape (no data movement).
    """
    sub = _SUBLANE_MULTIPLE.get(itemsize, 8)
    for lanes in _LANE_WIDTHS:
        if total % lanes:
            continue
        rows = total // lanes
        if rows == 0 or rows % sub:
            continue
        cap_rows = max(sub, (_MAX_BLOCK_BYTES // (lanes * itemsize)) // sub * sub)
        tile_rows = max(sub, (min(rows, cap_rows) // sub) * sub)
        while rows % tile_rows:          # always terminates: sub divides rows
            tile_rows -= sub
        return rows, lanes, tile_rows
    # total is a multiple of 128 but rows never hits the sublane multiple:
    # a single block equal to the full array dims is still legal if small.
    if total % 128 == 0 and total * itemsize <= _MAX_SINGLE_BLOCK_BYTES:
        rows = total // 128
        return rows, 128, rows
    return None


def reshape_forward(x, shape):
    """Pallas equivalent of Reshape(shape).forward(x) == x.view(shape)."""
    total = math.prod(x.shape)
    shape = _resolve_shape(shape, total)

    itemsize = jnp.dtype(x.dtype).itemsize
    slab = None if total == 0 else _pick_slab(total, itemsize)
    if slab is None:
        # Ragged / degenerate totals: a row-major .view() is metadata-only,
        # so the fastest correct implementation moves no data at all.
        return jnp.reshape(x, shape)

    rows, lanes, tile_rows = slab
    # Row-major flatten into a lane-dense 2-D slab: metadata-only for a
    # contiguous array (no pad, no tail slice, no extra HBM traffic).
    flat_2d = jnp.reshape(x, (rows, lanes))
    out_2d = _pallas_flat_copy(flat_2d, tile_rows)
    return jnp.reshape(out_2d, shape)


if __name__ == "__main__":
    key = jax.random.PRNGKey(0)
    # Input analogous to NCHW conv activations: (B=2, C=4, H=16, W=16).
    x = jax.random.normal(key, (2, 4, 16, 16), dtype=jnp.float32)

    # Reshape to (B, C*H, W) = (2, 64, 16), like Reshape(shape=(2, 64, 16)).
    y = reshape_forward(x, (2, 64, 16))
    y = jax.block_until_ready(y)
    ref = jnp.reshape(x, (2, 64, 16))
    assert y.shape == ref.shape and y.dtype == ref.dtype
    assert bool(jnp.all(y == ref))

    # -1 resolution path (torch .view semantics).
    y2 = reshape_forward(x, (2, -1))
    y2 = jax.block_until_ready(y2)
    ref2 = jnp.reshape(x, (2, -1))
    assert y2.shape == ref2.shape
    assert bool(jnp.all(y2 == ref2))

    print("KERNEL_OK")
</pallas_src>

<mosaic_0001>
module attributes {stable_mosaic.version = 11 : i64} {
  func.func @_copy_kernel(%arg0: i32, %arg1: memref<8x256xf32, #tpu.memory_space<vmem>>, %arg2: memref<8x256xf32, #tpu.memory_space<vmem>>) attributes {dimension_semantics = [#tpu.dimension_semantics<parallel>], iteration_bounds = array<i64: 1>, scalar_prefetch = 0 : i64, scratch_operands = 0 : i64, tpu.core_type = #tpu.core_type<tc>, window_params = [{transform_indices = @transform_0, window_bounds = array<i64: 8, 256>}, {transform_indices = @transform_1, window_bounds = array<i64: 8, 256>}]} {
    %c0 = arith.constant 0 : index
    %c0_0 = arith.constant 0 : index
    %0 = vector.load %arg1[%c0, %c0_0] : memref<8x256xf32, #tpu.memory_space<vmem>>, vector<8x256xf32>
    %c0_1 = arith.constant 0 : index
    %c0_2 = arith.constant 0 : index
    %1 = vector.load %arg2[%c0_1, %c0_2] : memref<8x256xf32, #tpu.memory_space<vmem>>, vector<8x256xf32>
    tpu.vector_store %arg2[%c0_1, %c0_2], %0 {strides = array<i32>} : memref<8x256xf32, #tpu.memory_space<vmem>>, vector<8x256xf32>,
    return
  }
  func.func @transform_0(%arg0: i32) -> (i32, i32) {
    %c0_i32 = arith.constant 0 : i32
    %c0_i32_0 = arith.constant 0 : i32
    return %arg0, %c0_i32 : i32, i32
  }
  func.func @transform_1(%arg0: i32) -> (i32, i32) {
    %c0_i32 = arith.constant 0 : i32
    %c0_i32_0 = arith.constant 0 : i32
    return %arg0, %c0_i32 : i32, i32
  }
}

</mosaic_0001>

<bundles_post_ra>
// kernel: tpu_custom_call.1
= control target key start
LH: loop header
LB: loop body
LE: loop exit
PB: predicated region body
PF: predicated region fallthrough
CT: control target
= control target key end

     0   :  { %6 = vsyncpa [#allocation3], 0  ;;  %s104_s0 = inlined_call_operand.hbm [shape: f32[8,256], index: 0, kind: input, shape index: {}]   ;;  %s105_s1 = inlined_call_operand.hbm [shape: f32[8,256], index: 1, kind: output, shape index: {}]  }
   0x1   :  { %7 = vsyncpa [#allocation4], 0  ;;  %s86_s6 = smov [#allocation2]  }
   0x2   :  { %s14_s7 = sshll.u32 %s86_s6, 4  ;;  %s15_s7 = int_to_ptr.vmem [resolvable:$true] %s14_s7 }
   0x3   :  { %s50_s8 = scalar_lea.vmem %s15_s7, 256  ;;  %p55_p1 = scmp.lt.s32.totalorder %s15_s7, %s15_s7 }
   0x4   :  { %p51_p0 = scmp.ne.s32.totalorder %s15_s7, %s50_s8  ;;  %p56_p2 = scmp.lt.s32.totalorder %s50_s8, %s50_s8 }
   0x6   :  { %p57_p3 = por %p56_p2, %p55_p1 }
   0x8   :  { %p58_p4 = pnand %p57_p3, %p51_p0 }
   0xa   :  { %61 = shalt.err (!%p58_p4)
}
   0xb   :  { %17 = dma.hbm_to_vmem [thread:$0]  %s104_s0, 256, %s15_s7, [#allocation3]  }
   0xc   :  { %82 = dma.done.wait [#allocation3], 256  }
   0xd   :  { %83 = vsyncadd [#allocation3], 4294967040  ;;  %s87_s11 = smov [#allocation5]   ;;  %v21_v0 = vld [vmem:[#allocation2] sm:$0xff]  ;;  %v22_v1 = vld [vmem:[#allocation2 + $0x8] sm:$0xff] }
   0xe   :  { %s31_s12 = sshll.u32 %s87_s11, 4  ;;  %23 = vst [vmem:[#allocation5] sm:$0xff] %v21_v0  ;;  %24 = vst [vmem:[#allocation5 + $0x8] sm:$0xff] %v22_v1  ;;  %s32_s12 = int_to_ptr.vmem [resolvable:$true] %s31_s12 }
   0xf   :  { %s62_s13 = scalar_lea.vmem %s32_s12, 256  ;;  %p67_p6 = scmp.lt.s32.totalorder %s32_s12, %s32_s12 }
  0x10   :  { %p63_p5 = scmp.ne.s32.totalorder %s32_s12, %s62_s13  ;;  %p68_p7 = scmp.lt.s32.totalorder %s62_s13, %s62_s13 }
  0x12   :  { %p69_p8 = por %p68_p7, %p67_p6 }
  0x14   :  { %p70_p9 = pnand %p69_p8, %p63_p5 }
  0x16   :  { %73 = shalt.err (!%p70_p9)
}
  0x17   :  { %34 = dma.vmem_to_hbm [thread:$0]  %s32_s12, 256, %s105_s1, [#allocation4]  }
  0x18   :  { %84 = dma.done.wait [#allocation4], 256  }
  0x19   :  { %85 = vsyncadd [#allocation4], 4294967040 }
  0x1a   :  { %38 = vsyncpa [#allocation3], 1 }
  0x1b   :  { %39 = vsyncpa [#allocation4], 1 }

</bundles_post_ra>
